<compile_context>
chip_gen: v7x
topology: tpu7x:2x2x1
jax: 0.10.0
libtpu: 0.0.40
codegen_flags: <defaults>
</compile_context>

<pallas_src>
import functools

import jax
import jax.numpy as jnp
from jax.experimental import pallas as pl
from jax.experimental.pallas import tpu as pltpu

N_CLASSES = 2
N_FEATURES = 100
PSI_DIM = 10


def _round_up(n, m):
    return ((n + m - 1) // m) * m


def _default_tile_rows():
    """Per-generation default row tile: amortize per-step overhead, stay in scoped VMEM."""
    try:
        kind = jax.devices()[0].device_kind.lower()
    except Exception:
        return 4096
    if "v6" in kind or "v7" in kind or "6e" in kind or "7x" in kind:
        return 8192     # ~16 MiB double-buffered VMEM at f32 (32 MiB scoped default)
    return 4096         # v5e: 16 MiB scoped-VMEM default -> ~8 MiB used


def _make_matmul_kernel(precision):
    def kernel(wrt_ref, x_ref, o_ref):
        # wrt_ref : (N_FEATURES, N_CLASSES) -- constant block, stays resident
        # x_ref   : (TILE_T, N_FEATURES)
        # o_ref   : (TILE_T, N_CLASSES)
        o_ref[...] = jnp.dot(x_ref[...], wrt_ref[...],
                             preferred_element_type=jnp.float32,
                             precision=precision)
    return kernel


@functools.partial(
    jax.jit, static_argnames=("compute_dtype", "tile_t", "xla_rows_threshold"))
def complex_net_vmap_forward(x, A_stack, psi_stack, *,
                             compute_dtype=jnp.float32,
                             tile_t=None,
                             xla_rows_threshold=0):
    """Forward pass of ComplexNetVmap.

    x:         (T, N_FEATURES) float
    A_stack:   (2, N_CLASSES, PSI_DIM, PSI_DIM, N_FEATURES) float
    psi_stack: (2, PSI_DIM) float
    returns:   (T, N_CLASSES) float32
    """
    T = x.shape[0]
    assert x.shape[1] == N_FEATURES

    hp = jax.lax.Precision.HIGHEST

    # ---- Parameter-only glue (hoisted out of the kernel, f32/HIGHEST) -----
    psi_r = psi_stack[0].astype(jnp.float32)
    psi_i = psi_stack[1].astype(jnp.float32)
    # P_{ij} = conj(psi)_i * psi_j
    p_real = psi_r[:, None] * psi_r[None, :] + psi_i[:, None] * psi_i[None, :]
    p_imag = psi_r[:, None] * psi_i[None, :] - psi_i[:, None] * psi_r[None, :]
    pr = p_real.reshape(PSI_DIM * PSI_DIM)                     # (100,)
    pi = p_imag.reshape(PSI_DIM * PSI_DIM)                     # (100,)

    ar = A_stack[0].reshape(N_CLASSES, PSI_DIM * PSI_DIM, N_FEATURES).astype(jnp.float32)
    ai = A_stack[1].reshape(N_CLASSES, PSI_DIM * PSI_DIM, N_FEATURES).astype(jnp.float32)

    # Wr_{k,a} = sum_p [ pr_p * ar_{kpa} - pi_p * ai_{kpa} ]
    wr = (jnp.einsum('p,kpa->ka', pr, ar, precision=hp)
          - jnp.einsum('p,kpa->ka', pi, ai, precision=hp))     # (N_CLASSES, N_FEATURES)

    x_c = x.astype(compute_dtype)        # no-op when x is already compute_dtype
    wrt = wr.T.astype(compute_dtype)     # (N_FEATURES, N_CLASSES)

    # Optional fast path: for tiny batches the pallas_call launch overhead
    # dominates; a fused XLA dot matches or beats the kernel there.
    if xla_rows_threshold and T <= xla_rows_threshold:
        return jnp.dot(x_c, wrt, preferred_element_type=jnp.float32, precision=hp)

    # ---- Row tiling: ragged last block, no HBM padding copies -------------
    if tile_t is None:
        tile_t = _default_tile_rows()
    sub = 8 if jnp.dtype(compute_dtype).itemsize >= 4 else 16
    eff_tile = min(int(tile_t), _round_up(max(T, 1), sub))
    eff_tile = _round_up(eff_tile, sub)
    if eff_tile >= T:
        eff_tile = T                     # single full-extent block (always layout-legal)
    n_tiles = pl.cdiv(T, eff_tile)

    in_bytes = jnp.dtype(compute_dtype).itemsize
    # HBM footprint with TPU tiled layout (minor dim lane-padded to 128).
    cost = pl.CostEstimate(
        flops=2 * T * N_FEATURES * N_CLASSES,
        transcendentals=0,
        bytes_accessed=(T * 128 * in_bytes        # x read   (100 -> 128 lanes)
                        + 128 * 128 * in_bytes    # WrT read (tiny, resident)
                        + T * 128 * 4),           # out write (2 -> 128 lanes)
    )

    precision = hp if jnp.dtype(compute_dtype) == jnp.dtype(jnp.float32) \
        else jax.lax.Precision.DEFAULT
    kernel = _make_matmul_kernel(precision)

    out = pl.pallas_call(
        kernel,
        out_shape=jax.ShapeDtypeStruct((T, N_CLASSES), jnp.float32),
        grid=(n_tiles,),
        in_specs=[
            pl.BlockSpec((N_FEATURES, N_CLASSES), lambda i: (0, 0)),
            pl.BlockSpec((eff_tile, N_FEATURES), lambda i: (i, 0)),
        ],
        out_specs=pl.BlockSpec((eff_tile, N_CLASSES), lambda i: (i, 0)),
        compiler_params=pltpu.CompilerParams(
            dimension_semantics=("parallel",)),
        cost_estimate=cost,
    )(wrt, x_c)
    return out


def reference_forward(x, A_stack, psi_stack):
    """Pure-JAX complex reference, mirrors the PyTorch einsum exactly."""
    psi = psi_stack[0].astype(jnp.complex64) + 1j * psi_stack[1].astype(jnp.complex64)
    A = A_stack[0].astype(jnp.complex64) + 1j * A_stack[1].astype(jnp.complex64)
    x_c = x.astype(jnp.complex64)   # torch stacks zeros for the imaginary part
    res = jnp.einsum('i,kija,ta,j->tk', jnp.conj(psi), A, x_c, psi,
                     precision=jax.lax.Precision.HIGHEST)
    return res.real


if __name__ == "__main__":
    key = jax.random.PRNGKey(0)
    k_a, k_psi, k_x1, k_x2, k_x3, k_x4 = jax.random.split(key, 6)

    # Parameters, matching the torch.randn shapes in __init__.
    A_stack = jax.random.normal(
        k_a, (2, N_CLASSES, PSI_DIM, PSI_DIM, N_FEATURES), dtype=jnp.float32)
    psi_stack = jax.random.normal(k_psi, (2, PSI_DIM), dtype=jnp.float32)

    def check(out, ref, rtol, atol_frac):
        assert out.shape == ref.shape, (out.shape, ref.shape)
        scale = float(jnp.max(jnp.abs(ref)))
        ok = bool(jnp.allclose(out, ref, rtol=rtol, atol=atol_frac * scale))
        assert ok, ("max abs err", float(jnp.max(jnp.abs(out - ref))),
                    "ref scale", scale)

    # 1) Tiny batch, f32, single full-extent block.
    T1 = 8
    x1 = jax.random.normal(k_x1, (T1, N_FEATURES), dtype=jnp.float32)
    out1 = jax.block_until_ready(complex_net_vmap_forward(x1, A_stack, psi_stack))
    check(out1, reference_forward(x1, A_stack, psi_stack), rtol=1e-2, atol_frac=1e-2)

    # 2) T not divisible by the tile: multi-step grid with a ragged last block
    #    (no HBM padding copies, OOB output rows masked by Pallas).
    T2 = 200
    x2 = jax.random.normal(k_x2, (T2, N_FEATURES), dtype=jnp.float32)
    out2 = jax.block_until_ready(
        complex_net_vmap_forward(x2, A_stack, psi_stack, tile_t=64))
    check(out2, reference_forward(x2, A_stack, psi_stack), rtol=1e-2, atol_frac=1e-2)

    # 3) bf16 fast path (x + Wr rounded to bf16, f32 accumulation) with a
    #    scale-aware tolerance appropriate for a K=100 bf16 contraction.
    T3 = 333
    x3 = jax.random.normal(k_x3, (T3, N_FEATURES), dtype=jnp.float32)
    out3 = jax.block_until_ready(
        complex_net_vmap_forward(x3, A_stack, psi_stack,
                                 compute_dtype=jnp.bfloat16, tile_t=128))
    check(out3, reference_forward(x3, A_stack, psi_stack), rtol=5e-2, atol_frac=3e-2)

    # 4) Default settings (per-generation tile, f32) on a mid-size batch.
    T4 = 2500
    x4 = jax.random.normal(k_x4, (T4, N_FEATURES), dtype=jnp.float32)
    out4 = jax.block_until_ready(complex_net_vmap_forward(x4, A_stack, psi_stack))
    check(out4, reference_forward(x4, A_stack, psi_stack), rtol=1e-2, atol_frac=1e-2)

    print("KERNEL_OK")
</pallas_src>

<mosaic_0001>
module attributes {stable_mosaic.version = 11 : i64} {
  func.func @kernel(%arg0: i32, %arg1: memref<100x2xf32, #tpu.memory_space<vmem>>, %arg2: memref<8x100xf32, #tpu.memory_space<vmem>>, %arg3: memref<8x2xf32, #tpu.memory_space<vmem>>) attributes {dimension_semantics = [#tpu.dimension_semantics<parallel>], iteration_bounds = array<i64: 1>, scalar_prefetch = 0 : i64, scratch_operands = 0 : i64, tpu.core_type = #tpu.core_type<tc>, window_params = [{pipeline_mode = #tpu.pipeline_mode<synchronous>, transform_indices = @transform_0, window_bounds = array<i64: 100, 2>}, {transform_indices = @transform_1, window_bounds = array<i64: 8, 100>}, {transform_indices = @transform_2, window_bounds = array<i64: 8, 2>}]} {
    %c0 = arith.constant 0 : index
    %c0_0 = arith.constant 0 : index
    %0 = vector.load %arg2[%c0, %c0_0] : memref<8x100xf32, #tpu.memory_space<vmem>>, vector<8x100xf32>
    %c0_1 = arith.constant 0 : index
    %c0_2 = arith.constant 0 : index
    %1 = vector.load %arg1[%c0_1, %c0_2] : memref<100x2xf32, #tpu.memory_space<vmem>>, vector<100x2xf32>
    %cst = arith.constant dense<0.000000e+00> : vector<8x2xf32>
    %2 = tpu.matmul %0, %1, %cst {dimension_numbers = #tpu.dot_dimension_numbers<[1], [0], [0], [1], [0, 0, 1, 1], [], []>, precision = #tpu.contract_precision<fp32>} : vector<8x100xf32>, vector<100x2xf32>, vector<8x2xf32> -> vector<8x2xf32>
    %c0_3 = arith.constant 0 : index
    %c0_4 = arith.constant 0 : index
    %3 = vector.load %arg3[%c0_3, %c0_4] : memref<8x2xf32, #tpu.memory_space<vmem>>, vector<8x2xf32>
    tpu.vector_store %arg3[%c0_3, %c0_4], %2 {strides = array<i32>} : memref<8x2xf32, #tpu.memory_space<vmem>>, vector<8x2xf32>,
    return
  }
  func.func @transform_0(%arg0: i32) -> (i32, i32) {
    %c0_i32 = arith.constant 0 : i32
    %c0_i32_0 = arith.constant 0 : i32
    %c0_i32_1 = arith.constant 0 : i32
    return %c0_i32, %c0_i32_0 : i32, i32
  }
  func.func @transform_1(%arg0: i32) -> (i32, i32) {
    %c0_i32 = arith.constant 0 : i32
    %c0_i32_0 = arith.constant 0 : i32
    return %arg0, %c0_i32 : i32, i32
  }
  func.func @transform_2(%arg0: i32) -> (i32, i32) {
    %c0_i32 = arith.constant 0 : i32
    %c0_i32_0 = arith.constant 0 : i32
    return %arg0, %c0_i32 : i32, i32
  }
}

</mosaic_0001>

<bundles_post_ra>
// kernel: sub.4
= control target key start
LH: loop header
LB: loop body
LE: loop exit
PB: predicated region body
PF: predicated region fallthrough
CT: control target
= control target key end

     0   :  { %s34_s0 = inlined_call_operand.vmem [shape: f32[2,100], index: 0, kind: input, shape index: {}]   ;;  %s35_s1 = inlined_call_operand.vmem [shape: f32[2,100], index: 1, kind: input, shape index: {}]   ;;  %s36_s2 = inlined_call_operand.vmem [shape: f32[2,100], index: 2, kind: output, shape index: {}]  }
   0x1   :  { %v3_v0 = vld [vmem:[%s34_s0] sm:$0x3] }
   0x2   :  { %v4_v1 = vld [vmem:[%s35_s1] sm:$0x3] }
   0x3   :  { %v7_v2 = vsub.f32 %v3_v0, %v4_v1 }
   0x5   :  { %9 = vst [vmem:[%s36_s2] sm:$0x3] %v7_v2 }

// kernel: complex_net_vmap_forward.1
= control target key start
LH: loop header
LB: loop body
LE: loop exit
PB: predicated region body
PF: predicated region fallthrough
CT: control target
= control target key end

     0   :  { %v1019_v0 = vmov 0.0|0.0   ;;  %vm1020_vm0 = vmmov 0   ;;  %v1021_v8 = vmov 0.0   ;;  %vm25_vm1 = vcmask 818176   ;;  %s1248_s0 = inlined_call_operand.vmem [shape: f32[100,2], index: 0, kind: input, shape index: {}]   ;;  %s1249_s1 = inlined_call_operand.vmem [shape: f32[8,100], index: 1, kind: input, shape index: {}]   ;;  %s1250_s2 = inlined_call_operand.vmem [shape: f32[8,2], index: 2, kind: output, shape index: {}]  }
   0x1   :  { %899 = vmatprep.subr.bf16.mxu1 %v1019_v0  ;;  %953 = vmatprep.subr.bf16.mxu0 %v1019_v0  ;;  %v12_v1 = vld [vmem:[%s1248_s0] sm:$0xff]  ;;  %v13_v2 = vld [vmem:[%s1248_s0 + $0x8] sm:$0xff]  ;;  %v14_v3 = vld [vmem:[%s1248_s0 + $0x10] sm:$0xff]  ;;  %vm29_vm2 = vcmask 1043456   ;;  %vm635_vm3 = vcmask 15360  }
   0x2   :  { %v34_v4 = vand.u32 4294901760, %v12_v1  ;;  %v37_v5 = vand.u32 4294901760, %v13_v2  ;;  %v15_v6 = vld [vmem:[%s1248_s0 + $0x18] sm:$0xff]  ;;  %v40_v7 = vand.u32 4294901760, %v14_v3  ;;  %751 = vmatprep.mubr.msk.f32.mxu1 %vm1020_vm0, %v1021_v8  ;;  %838 = vmatprep.mubr.msk.f32.mxu0 %vm1020_vm0, %v1021_v8  ;;  %v16_v10 = vld [vmem:[%s1248_s0 + $0x20] sm:$0xff]  ;;  %v17_v11 = vld [vmem:[%s1248_s0 + $0x28] sm:$0xff] }
   0x3   :  { %v43_v9 = vand.u32 4294901760, %v15_v6  ;;  %v46_v14 = vand.u32 4294901760, %v16_v10  ;;  %v49_v15 = vand.u32 4294901760, %v17_v11  ;;  %v18_v16 = vld [vmem:[%s1248_s0 + $0x30] sm:$0xff]  ;;  %v19_v17 = vld [vmem:[%s1248_s0 + $0x38] sm:$0xff]  ;;  %v11_v18 = vld [vmem:[%s1249_s1] sm:$0xff] }
   0x4   :  { %v1061_v12 = vpack.c.bf16 %v37_v5, %v34_v4  ;;  %v52_v20 = vand.u32 4294901760, %v18_v16  ;;  %v55_v21 = vand.u32 4294901760, %v19_v17  ;;  %v27_v22 = vsel %vm25_vm1, %v11_v18, 0  ;;  %v20_v23 = vld [vmem:[%s1248_s0 + $0x40] sm:$0xff]  ;;  %v21_v24 = vld [vmem:[%s1248_s0 + $0x48] sm:$0xff]  ;;  %v22_v31 = vld [vmem:[%s1248_s0 + $0x50] sm:$0xff] }
   0x5   :  { %v1065_v13 = vpack.c.bf16 %v43_v9, %v40_v7  ;;  %v1080_v19 = vpack.c.bf16 %v49_v15, %v46_v14  ;;  %v1090_v25 = vand.u32 4294901760, %v27_v22  ;;  %v1092_v26 = vsub.f32 %v12_v1, %v34_v4  ;;  %v23_v32 = vld [vmem:[%s1248_s0 + $0x58] sm:$0xff]  ;;  %v24_v43 = vld [vmem:[%s1248_s0 + $0x60] sm:$0xf] }
   0x6   :  { %901 = vmatpush3.bf16.msra.mxu1 %v1061_v12  ;;  %955 = vmatpush3.bf16.msra.mxu0 %v1061_v12  ;;  %v1094_v27 = vsub.f32 %v13_v2, %v37_v5  ;;  %v1098_v28 = vpack.c.bf16 %v55_v21, %v52_v20  ;;  %v58_v29 = vand.u32 4294901760, %v20_v23  ;;  %v61_v30 = vand.u32 4294901760, %v21_v24 }
   0x7   :  { %902 = vmatprep.subr.bf16.mxu1 %v1019_v0  ;;  %956 = vmatprep.subr.bf16.mxu0 %v1019_v0  ;;  %v1109_v33 = vsub.f32 %v27_v22, %v1090_v25  ;;  %v1111_v34 = vsub.f32 %v14_v3, %v40_v7  ;;  %v1113_v35 = vsub.f32 %v15_v6, %v43_v9  ;;  %v124_v36 = vand.u32 4294901760, %v1092_v26 }
   0x8   :  { %v131_v37 = vand.u32 4294901760, %v1094_v27  ;;  %v1119_v38 = vpack.c.bf16 %v61_v30, %v58_v29  ;;  %v64_v39 = vand.u32 4294901760, %v22_v31  ;;  %v67_v40 = vand.u32 4294901760, %v23_v32 }
   0x9   :  { %v1123_v41 = vsub.f32 %v16_v10, %v46_v14  ;;  %v1125_v42 = vsub.f32 %v17_v11, %v49_v15  ;;  %v113_v44 = vand.u32 4294901760, %v1109_v33  ;;  %v125_v45 = vsub.f32 %v1092_v26, %v124_v36 }
   0xa   :  { %904 = vmatpush3.bf16.msra.mxu1 %v1065_v13  ;;  %958 = vmatpush3.bf16.msra.mxu0 %v1065_v13  ;;  %v132_v46 = vsub.f32 %v1094_v27, %v131_v37  ;;  %v138_v47 = vand.u32 4294901760, %v1111_v34  ;;  %v145_v48 = vand.u32 4294901760, %v1113_v35  ;;  %v1137_v49 = vpack.c.bf16 %v67_v40, %v64_v39 }
   0xb   :  { %905 = vmatprep.subr.bf16.mxu1 %v1019_v0  ;;  %959 = vmatprep.subr.bf16.mxu0 %v1019_v0  ;;  %v1139_v50 = vsub.f32 %v18_v16, %v52_v20  ;;  %v31_v51 = vsel %vm29_vm2, %v24_v43, 0  ;;  %v1143_v52 = vsub.f32 %v19_v17, %v55_v21  ;;  %v114_v53 = vsub.f32 %v1109_v33, %v113_v44 }
   0xc   :  { %v152_v54 = vand.u32 4294901760, %v1123_v41  ;;  %v159_v55 = vand.u32 4294901760, %v1125_v42  ;;  %v126_v56 = vand.u32 4294901760, %v125_v45  ;;  %v133_v57 = vand.u32 4294901760, %v132_v46 }
   0xd   :  { %v139_v58 = vsub.f32 %v1111_v34, %v138_v47  ;;  %v146_v59 = vsub.f32 %v1113_v35, %v145_v48  ;;  %v1152_v60 = vand.u32 4294901760, %v31_v51  ;;  %v1154_v61 = vsub.f32 %v20_v23, %v58_v29 }
   0xe   :  { %907 = vmatpush3.bf16.msra.mxu1 %v1080_v19  ;;  %961 = vmatpush3.bf16.msra.mxu0 %v1080_v19  ;;  %v1156_v62 = vsub.f32 %v21_v24, %v61_v30  ;;  %v972_v63 = vpack.c.bf16 %v131_v37, %v124_v36  ;;  %v115_v1 = vand.u32 4294901760, %v114_v53  ;;  %v153_v2 = vsub.f32 %v1123_v41, %v152_v54 }
   0xf   :  { %908 = vmatprep.subr.bf16.mxu1 %v1019_v0  ;;  %962 = vmatprep.subr.bf16.mxu0 %v1019_v0  ;;  %v160_v3 = vsub.f32 %v1125_v42, %v159_v55  ;;  %v166_v4 = vand.u32 4294901760, %v1139_v50  ;;  %v918_v5 = vpack.c.bf16 %v133_v57, %v126_v56  ;;  %v140_v6 = vand.u32 4294901760, %v139_v58 }
  0x10   :  { %v147_v7 = vand.u32 4294901760, %v146_v59  ;;  %v173_v9 = vand.u32 4294901760, %v1143_v52  ;;  %v1166_v10 = vsub.f32 %v22_v31, %v64_v39  ;;  %v1168_v11 = vsub.f32 %v23_v32, %v67_v40 }
  0x11   :  { %v154_v14 = vand.u32 4294901760, %v153_v2  ;;  %v161_v15 = vand.u32 4294901760, %v160_v3  ;;  %v167_v16 = vsub.f32 %v1139_v50, %v166_v4  ;;  %v180_v17 = vand.u32 4294901760, %v1154_v61 }
  0x12   :  { %910 = vmatpush3.bf16.msra.mxu1 %v1098_v28  ;;  %964 = vmatpush3.bf16.msra.mxu0 %v1098_v28  ;;  %v921_v18 = vpack.c.bf16 %v147_v7, %v140_v6  ;;  %v975_v20 = vpack.c.bf16 %v145_v48, %v138_v47  ;;  %v174_v21 = vsub.f32 %v1143_v52, %v173_v9  ;;  %v187_v22 = vand.u32 4294901760, %v1156_v62 }
  0x13   :  { %911 = vmatprep.subr.bf16.mxu1 %v1019_v0  ;;  %965 = vmatprep.subr.bf16.mxu0 %v1019_v0  ;;  %v924_v23 = vpack.c.bf16 %v161_v15, %v154_v14  ;;  %v978_v24 = vpack.c.bf16 %v159_v55, %v152_v54  ;;  %v168_v29 = vand.u32 4294901760, %v167_v16  ;;  %v181_v30 = vsub.f32 %v1154_v61, %v180_v17 }
  0x14   :  { %v175_v31 = vand.u32 4294901760, %v174_v21  ;;  %v188_v32 = vsub.f32 %v1156_v62, %v187_v22  ;;  %v194_v36 = vand.u32 4294901760, %v1166_v10  ;;  %v201_v37 = vand.u32 4294901760, %v1168_v11 }
  0x15   :  { %v1189_v39 = vsub.f32 %v31_v51, %v1152_v60  ;;  %v981_v40 = vpack.c.bf16 %v173_v9, %v166_v4  ;;  %v182_v43 = vand.u32 4294901760, %v181_v30  ;;  %v984_v48 = vpack.c.bf16 %v187_v22, %v180_v17 }
  0x16   :  { %913 = vmatpush3.bf16.msra.mxu1 %v1119_v38  ;;  %967 = vmatpush3.bf16.msra.mxu0 %v1119_v38  ;;  %v189_v45 = vand.u32 4294901760, %v188_v32  ;;  %v195_v46 = vsub.f32 %v1166_v10, %v194_v36  ;;  %v202_v47 = vsub.f32 %v1168_v11, %v201_v37  ;;  %v987_v57 = vpack.c.bf16 %v201_v37, %v194_v36 }
  0x17   :  { %914 = vmatprep.subr.bf16.mxu1 %v1019_v0  ;;  %968 = vmatprep.subr.bf16.mxu0 %v1019_v0  ;;  %v208_v55 = vand.u32 4294901760, %v1189_v39 }
  0x18   :  { %v930_v53 = vpack.c.bf16 %v189_v45, %v182_v43  ;;  %v196_v51 = vand.u32 4294901760, %v195_v46  ;;  %v203_v54 = vand.u32 4294901760, %v202_v47 }
  0x19   :  { %v209_v58 = vsub.f32 %v1189_v39, %v208_v55 }
  0x1a   :  { %916 = vmatpush3.bf16.msra.mxu1 %v1137_v49  ;;  %970 = vmatpush3.bf16.msra.mxu0 %v1137_v49  ;;  %v933_v56 = vpack.c.bf16 %v203_v54, %v196_v51 }
  0x1b   :  { %749 = vmatprep.subr.mxu1 %v1021_v8  ;;  %836 = vmatprep.subr.mxu0 %v1021_v8  ;;  %v210_v59 = vand.u32 4294901760, %v209_v58 }
  0x1e   :  { %750 = vmatpush3.msra.mxu1 %v1152_v60  ;;  %837 = vmatpush3.msra.mxu0 %v1152_v60 }
  0x1f   :  { %917 = vmatprep.subr.bf16.mxu1 %v1019_v0  ;;  %971 = vmatprep.subr.bf16.mxu0 %v1019_v0 }
  0x20   :  { %752 = vmatmul.mubr.f32.vlgmr.msra.gmra.mrb[0].mxu1 %v115_v1  ;;  %839 = vmatmul.mubr.f32.vlgmr.msra.gmra.mrb[0].mxu0 %v113_v44  ;;  %v927_v44 = vpack.c.bf16 %v175_v31, %v168_v29  ;;  %v939_v1 = vpack.c.bf16 %v1113_v35, %v1111_v34 }
  0x21   :  { %919 = vmatpush3.bf16.msra.mxu1 %v918_v5  ;;  %973 = vmatpush3.bf16.msra.mxu0 %v972_v63  ;;  %v936_v63 = vpack.c.bf16 %v1094_v27, %v1092_v26  ;;  %v942_v26 = vpack.c.bf16 %v1125_v42, %v1123_v41 }
  0x22   :  { %920 = vmatprep.subr.bf16.mxu1 %v1019_v0  ;;  %974 = vmatprep.subr.bf16.mxu0 %v1019_v0 }
  0x23   :  { %780 = vmatprep.mubr.msk.f32.mxu1 %vm1020_vm0, %v1021_v8  ;;  %867 = vmatprep.mubr.msk.f32.mxu0 %vm1020_vm0, %v1021_v8 }
  0x25   :  { %922 = vmatpush3.bf16.msra.mxu1 %v921_v18  ;;  %976 = vmatpush3.bf16.msra.mxu0 %v975_v20 }
  0x26   :  { %923 = vmatprep.subr.bf16.mxu1 %v1019_v0  ;;  %977 = vmatprep.subr.bf16.mxu0 %v1019_v0 }
  0x29   :  { %925 = vmatpush3.bf16.msra.mxu1 %v924_v23  ;;  %979 = vmatpush3.bf16.msra.mxu0 %v978_v24 }
  0x2a   :  { %926 = vmatprep.subr.bf16.mxu1 %v1019_v0  ;;  %980 = vmatprep.subr.bf16.mxu0 %v1019_v0 }
  0x2d   :  { %928 = vmatpush3.bf16.msra.mxu1 %v927_v44  ;;  %982 = vmatpush3.bf16.msra.mxu0 %v981_v40 }
  0x2e   :  { %929 = vmatprep.subr.bf16.mxu1 %v1019_v0  ;;  %983 = vmatprep.subr.bf16.mxu0 %v1019_v0 }
  0x31   :  { %931 = vmatpush3.bf16.msra.mxu1 %v930_v53  ;;  %985 = vmatpush3.bf16.msra.mxu0 %v984_v48 }
  0x32   :  { %932 = vmatprep.subr.bf16.mxu1 %v1019_v0  ;;  %986 = vmatprep.subr.bf16.mxu0 %v1019_v0 }
  0x35   :  { %934 = vmatpush3.bf16.msra.mxu1 %v933_v56  ;;  %988 = vmatpush3.bf16.msra.mxu0 %v987_v57 }
  0x36   :  { %778 = vmatprep.subr.mxu1 %v1021_v8  ;;  %865 = vmatprep.subr.mxu0 %v1021_v8 }
  0x39   :  { %779 = vmatpush3.msra.mxu1 %v210_v59  ;;  %866 = vmatpush3.msra.mxu0 %v208_v55 }
  0x3a   :  { %935 = vmatprep.subr.bf16.mxu1 %v1019_v0  ;;  %989 = vmatprep.subr.bf16.mxu0 %v1019_v0 }
  0x3b   :  { %781 = vmatmul.mubr.f32.vlgmr.msra.gmra.mrb[0].mxu1 %v1090_v25  ;;  %868 = vmatmul.mubr.f32.vlgmr.msra.gmra.mrb[0].mxu0 %v1090_v25 }
  0x3c   :  { %937 = vmatpush3.bf16.msra.mxu1 %v936_v63  ;;  %991 = vmatpush3.bf16.msra.mxu0 %v1061_v12  ;;  %v945_v12 = vpack.c.bf16 %v1143_v52, %v1139_v50 }
  0x3d   :  { %938 = vmatprep.subr.bf16.mxu1 %v1019_v0  ;;  %992 = vmatprep.subr.bf16.mxu0 %v1019_v0 }
  0x3e   :  { %809 = vmatprep.mubr.msk.f32.mxu1 %vm1020_vm0, %v1021_v8  ;;  %896 = vmatprep.mubr.msk.f32.mxu0 %vm1020_vm0, %v1021_v8 }
  0x40   :  { %940 = vmatpush3.bf16.msra.mxu1 %v939_v1  ;;  %994 = vmatpush3.bf16.msra.mxu0 %v1065_v13  ;;  %v948_v13 = vpack.c.bf16 %v1156_v62, %v1154_v61 }
  0x41   :  { %941 = vmatprep.subr.bf16.mxu1 %v1019_v0  ;;  %995 = vmatprep.subr.bf16.mxu0 %v1019_v0 }
  0x44   :  { %943 = vmatpush3.bf16.msra.mxu1 %v942_v26  ;;  %997 = vmatpush3.bf16.msra.mxu0 %v1080_v19  ;;  %v951_v19 = vpack.c.bf16 %v1168_v11, %v1166_v10 }
  0x45   :  { %944 = vmatprep.subr.bf16.mxu1 %v1019_v0  ;;  %998 = vmatprep.subr.bf16.mxu0 %v1019_v0 }
  0x48   :  { %946 = vmatpush3.bf16.msra.mxu1 %v945_v12  ;;  %1000 = vmatpush3.bf16.msra.mxu0 %v1098_v28 }
  0x49   :  { %947 = vmatprep.subr.bf16.mxu1 %v1019_v0  ;;  %1001 = vmatprep.subr.bf16.mxu0 %v1019_v0 }
  0x4c   :  { %949 = vmatpush3.bf16.msra.mxu1 %v948_v13  ;;  %1003 = vmatpush3.bf16.msra.mxu0 %v1119_v38 }
  0x4d   :  { %950 = vmatprep.subr.bf16.mxu1 %v1019_v0  ;;  %1004 = vmatprep.subr.bf16.mxu0 %v1019_v0 }
  0x50   :  { %952 = vmatpush3.bf16.msra.mxu1 %v951_v19  ;;  %1006 = vmatpush3.bf16.msra.mxu0 %v1137_v49 }
  0x51   :  { %807 = vmatprep.subr.mxu1 %v1021_v8  ;;  %894 = vmatprep.subr.mxu0 %v1021_v8 }
  0x54   :  { %808 = vmatpush3.msra.mxu1 %v1189_v39  ;;  %895 = vmatpush3.msra.mxu0 %v1152_v60 }
  0x55   :  { %810 = vmatmul.mubr.f32.vlgmr.msra.gmra.mrb[0].mxu1 %v1109_v33  ;;  %897 = vmatmul.mubr.f32.vlgmr.msra.gmra.mrb[0].mxu0 %v1090_v25 }
 0x128   :  { %v351_v27 = vpop.f32.mrb[0].mxu1  ;;  %v631_v28 = vpop.f32.mrb[0].mxu0 }
 0x129   :  { %v1007_v34 = vadd.f32 %v631_v28, %v351_v27  ;;  %v811_v0 = vpop.f32.mrb[1].mxu1  ;;  %v898_v35 = vpop.f32.mrb[1].mxu0 }
 0x12b   :  { %636 = vst.msk [vmem:[%s1250_s2] sm:$0xff] %vm635_vm3, %v1007_v34 }

</bundles_post_ra>
